<compile_context>
chip_gen: v6e
topology: v6e:2x2x1
jax: 0.10.0
libtpu: 0.0.40
codegen_flags: <defaults>
</compile_context>

<pallas_src>
import jax
import jax.numpy as jnp
from jax.experimental import pallas as pl
from jax.experimental.pallas import tpu as pltpu


def decoder_kernel(x_ref, w1_ref, b1_ref, w2_ref, b2_ref, o_ref):
    x = x_ref[...]        # (TILE_B, 3)  f32
    w1 = w1_ref[...]      # (3, 64)      f32
    # Layer 1: K=3 contraction as three VPU broadcast FMAs (keeps the MXU free).
    h = (x[:, 0:1] * w1[0:1, :]
         + x[:, 1:2] * w1[1:2, :]
         + x[:, 2:3] * w1[2:3, :]
         + b1_ref[...])
    h = jnp.maximum(h, 0.0)                              # ReLU in f32 (VPU)
    # Layer 2 on the MXU: (TILE_B, 64) @ (64, 784), bf16 inputs, f32 accumulate.
    out = jnp.dot(h.astype(jnp.bfloat16), w2_ref[...],
                  preferred_element_type=jnp.float32)
    o_ref[...] = (out + b2_ref[...]).astype(o_ref.dtype)  # f32 epilogue


def _round_up(v, m):
    return ((v + m - 1) // m) * m


def decoder_forward(x, w1, b1, w2, b2, *, tile_b=512):
    B, in_dim = x.shape
    hid, out_dim = w2.shape                      # (64, 784)

    # Cast the layer-2 weight once; it stays VMEM-resident in bf16 (~100 KiB).
    w2_bf16 = w2.astype(jnp.bfloat16)

    # Batch tiling:
    #  - multiple of 8 (f32 sublanes),
    #  - clamp for small batches so we don't compute/write wasted rows,
    #  - prefer >=2 grid steps so the "parallel" axis can use both TCs on v7x.
    tile_b = max(8, _round_up(tile_b, 8))
    b8 = _round_up(B, 8)
    tile_b = min(tile_b, b8)
    if b8 >= 16 and b8 // tile_b < 2:
        tile_b = _round_up(pl.cdiv(b8, 2), 8)
    Bp = _round_up(B, tile_b)
    xp = jnp.pad(x, ((0, Bp - B), (0, 0))) if Bp != B else x

    grid = (Bp // tile_b,)
    flops = 2 * Bp * (in_dim * hid + hid * out_dim)
    bytes_accessed = (4 * (xp.size + w1.size + b1.size + b2.size + Bp * out_dim)
                      + 2 * w2_bf16.size)

    out = pl.pallas_call(
        decoder_kernel,
        out_shape=jax.ShapeDtypeStruct((Bp, out_dim), jnp.float32),
        grid=grid,
        in_specs=[
            pl.BlockSpec((tile_b, in_dim), lambda i: (i, 0)),   # streamed x tile
            pl.BlockSpec((in_dim, hid),    lambda i: (0, 0)),   # resident w1
            pl.BlockSpec((1, hid),         lambda i: (0, 0)),   # resident b1
            pl.BlockSpec((hid, out_dim),   lambda i: (0, 0)),   # resident w2 (bf16)
            pl.BlockSpec((1, out_dim),     lambda i: (0, 0)),   # resident b2
        ],
        out_specs=pl.BlockSpec((tile_b, out_dim), lambda i: (i, 0)),
        compiler_params=pltpu.CompilerParams(
            dimension_semantics=("parallel",)),
        cost_estimate=pl.CostEstimate(
            flops=flops, transcendentals=0, bytes_accessed=bytes_accessed),
    )(xp, w1, b1, w2_bf16, b2)

    return out[:B] if Bp != B else out


def init_params(key):
    # Deterministic synthetic init (PyTorch Linear shapes, stored transposed).
    k1, k2, k3, k4 = jax.random.split(key, 4)
    in_dim, hid, out_dim = 3, 64, 28 * 28
    lim1 = 1.0 / jnp.sqrt(in_dim)
    lim2 = 1.0 / jnp.sqrt(hid)
    w1 = jax.random.uniform(k1, (in_dim, hid), jnp.float32, -lim1, lim1)
    b1 = jax.random.uniform(k2, (1, hid), jnp.float32, -lim1, lim1)
    w2 = jax.random.uniform(k3, (hid, out_dim), jnp.float32, -lim2, lim2)
    b2 = jax.random.uniform(k4, (1, out_dim), jnp.float32, -lim2, lim2)
    return w1, b1, w2, b2


def reference_forward(x, w1, b1, w2, b2):
    h = jnp.maximum(x @ w1 + b1, 0.0)
    return h @ w2 + b2


if __name__ == "__main__":
    key = jax.random.PRNGKey(0)
    kx, kp = jax.random.split(key)
    batch = 8
    x = jax.random.normal(kx, (batch, 3), jnp.float32)   # latent input
    w1, b1, w2, b2 = init_params(kp)

    out = decoder_forward(x, w1, b1, w2, b2)
    out = jax.block_until_ready(out)

    ref = reference_forward(x, w1, b1, w2, b2)
    assert out.shape == (batch, 28 * 28)
    # Tolerance widened vs. the pure-f32 reference because layer 2 uses bf16
    # MXU inputs (f32 accumulation); observed error is well inside this bound.
    assert jnp.allclose(out, ref, atol=2e-2, rtol=2e-2)
    print("KERNEL_OK")
</pallas_src>

<mosaic_0001>
module attributes {stable_mosaic.version = 11 : i64} {
  func.func @decoder_kernel(%arg0: i32, %arg1: memref<8x3xf32, #tpu.memory_space<vmem>>, %arg2: memref<3x64xf32, #tpu.memory_space<vmem>>, %arg3: memref<1x64xf32, #tpu.memory_space<vmem>>, %arg4: memref<64x784xbf16, #tpu.memory_space<vmem>>, %arg5: memref<1x784xf32, #tpu.memory_space<vmem>>, %arg6: memref<8x784xf32, #tpu.memory_space<vmem>>) attributes {dimension_semantics = [#tpu.dimension_semantics<parallel>], iteration_bounds = array<i64: 1>, scalar_prefetch = 0 : i64, scratch_operands = 0 : i64, tpu.core_type = #tpu.core_type<tc>, window_params = [{transform_indices = @transform_0, window_bounds = array<i64: 8, 3>}, {pipeline_mode = #tpu.pipeline_mode<synchronous>, transform_indices = @transform_1, window_bounds = array<i64: 3, 64>}, {pipeline_mode = #tpu.pipeline_mode<synchronous>, transform_indices = @transform_2, window_bounds = array<i64: 1, 64>}, {pipeline_mode = #tpu.pipeline_mode<synchronous>, transform_indices = @transform_3, window_bounds = array<i64: 64, 784>}, {pipeline_mode = #tpu.pipeline_mode<synchronous>, transform_indices = @transform_4, window_bounds = array<i64: 1, 784>}, {transform_indices = @transform_5, window_bounds = array<i64: 8, 784>}]} {
    %c0 = arith.constant 0 : index
    %c0_0 = arith.constant 0 : index
    %0 = vector.load %arg1[%c0, %c0_0] : memref<8x3xf32, #tpu.memory_space<vmem>>, vector<8x3xf32>
    %c0_1 = arith.constant 0 : index
    %c0_2 = arith.constant 0 : index
    %1 = vector.load %arg2[%c0_1, %c0_2] : memref<3x64xf32, #tpu.memory_space<vmem>>, vector<3x64xf32>
    %2 = vector.extract_strided_slice %0 {offsets = [0, 0], sizes = [8, 1], strides = [1, 1]} : vector<8x3xf32> to vector<8x1xf32>
    %3 = vector.extract_strided_slice %1 {offsets = [0, 0], sizes = [1, 64], strides = [1, 1]} : vector<3x64xf32> to vector<1x64xf32>
    %4 = vector.broadcast %2 : vector<8x1xf32> to vector<8x64xf32>
    %5 = vector.broadcast %3 : vector<1x64xf32> to vector<8x64xf32>
    %6 = arith.mulf %4, %5 : vector<8x64xf32>
    %7 = vector.extract_strided_slice %0 {offsets = [0, 1], sizes = [8, 1], strides = [1, 1]} : vector<8x3xf32> to vector<8x1xf32>
    %8 = vector.extract_strided_slice %1 {offsets = [1, 0], sizes = [1, 64], strides = [1, 1]} : vector<3x64xf32> to vector<1x64xf32>
    %9 = vector.broadcast %7 : vector<8x1xf32> to vector<8x64xf32>
    %10 = vector.broadcast %8 : vector<1x64xf32> to vector<8x64xf32>
    %11 = arith.mulf %9, %10 : vector<8x64xf32>
    %12 = arith.addf %6, %11 : vector<8x64xf32>
    %13 = vector.extract_strided_slice %0 {offsets = [0, 2], sizes = [8, 1], strides = [1, 1]} : vector<8x3xf32> to vector<8x1xf32>
    %14 = vector.extract_strided_slice %1 {offsets = [2, 0], sizes = [1, 64], strides = [1, 1]} : vector<3x64xf32> to vector<1x64xf32>
    %15 = vector.broadcast %13 : vector<8x1xf32> to vector<8x64xf32>
    %16 = vector.broadcast %14 : vector<1x64xf32> to vector<8x64xf32>
    %17 = arith.mulf %15, %16 : vector<8x64xf32>
    %18 = arith.addf %12, %17 : vector<8x64xf32>
    %c0_3 = arith.constant 0 : index
    %c0_4 = arith.constant 0 : index
    %19 = vector.load %arg3[%c0_3, %c0_4] : memref<1x64xf32, #tpu.memory_space<vmem>>, vector<1x64xf32>
    %20 = vector.broadcast %19 : vector<1x64xf32> to vector<8x64xf32>
    %21 = arith.addf %18, %20 : vector<8x64xf32>
    %cst = arith.constant 0.000000e+00 : f32
    %22 = vector.broadcast %cst : f32 to vector<8x64xf32>
    %23 = arith.maximumf %21, %22 : vector<8x64xf32>
    %24 = arith.truncf %23 : vector<8x64xf32> to vector<8x64xbf16>
    %c0_5 = arith.constant 0 : index
    %c0_6 = arith.constant 0 : index
    %25 = vector.load %arg4[%c0_5, %c0_6] : memref<64x784xbf16, #tpu.memory_space<vmem>>, vector<64x784xbf16>
    %cst_7 = arith.constant dense<0.000000e+00> : vector<8x784xf32>
    %26 = tpu.matmul %24, %25, %cst_7 {dimension_numbers = #tpu.dot_dimension_numbers<[1], [0], [0], [1], [0, 0, 1, 1], [], []>} : vector<8x64xbf16>, vector<64x784xbf16>, vector<8x784xf32> -> vector<8x784xf32>
    %c0_8 = arith.constant 0 : index
    %c0_9 = arith.constant 0 : index
    %27 = vector.load %arg5[%c0_8, %c0_9] : memref<1x784xf32, #tpu.memory_space<vmem>>, vector<1x784xf32>
    %28 = vector.broadcast %27 : vector<1x784xf32> to vector<8x784xf32>
    %29 = arith.addf %26, %28 : vector<8x784xf32>
    %c0_10 = arith.constant 0 : index
    %c0_11 = arith.constant 0 : index
    %30 = vector.load %arg6[%c0_10, %c0_11] : memref<8x784xf32, #tpu.memory_space<vmem>>, vector<8x784xf32>
    tpu.vector_store %arg6[%c0_10, %c0_11], %29 {strides = array<i32>} : memref<8x784xf32, #tpu.memory_space<vmem>>, vector<8x784xf32>,
    return
  }
  func.func @transform_0(%arg0: i32) -> (i32, i32) {
    %c0_i32 = arith.constant 0 : i32
    %c0_i32_0 = arith.constant 0 : i32
    return %arg0, %c0_i32 : i32, i32
  }
  func.func @transform_1(%arg0: i32) -> (i32, i32) {
    %c0_i32 = arith.constant 0 : i32
    %c0_i32_0 = arith.constant 0 : i32
    %c0_i32_1 = arith.constant 0 : i32
    return %c0_i32, %c0_i32_0 : i32, i32
  }
  func.func @transform_2(%arg0: i32) -> (i32, i32) {
    %c0_i32 = arith.constant 0 : i32
    %c0_i32_0 = arith.constant 0 : i32
    %c0_i32_1 = arith.constant 0 : i32
    return %c0_i32, %c0_i32_0 : i32, i32
  }
  func.func @transform_3(%arg0: i32) -> (i32, i32) {
    %c0_i32 = arith.constant 0 : i32
    %c0_i32_0 = arith.constant 0 : i32
    %c0_i32_1 = arith.constant 0 : i32
    return %c0_i32, %c0_i32_0 : i32, i32
  }
  func.func @transform_4(%arg0: i32) -> (i32, i32) {
    %c0_i32 = arith.constant 0 : i32
    %c0_i32_0 = arith.constant 0 : i32
    %c0_i32_1 = arith.constant 0 : i32
    return %c0_i32, %c0_i32_0 : i32, i32
  }
  func.func @transform_5(%arg0: i32) -> (i32, i32) {
    %c0_i32 = arith.constant 0 : i32
    %c0_i32_0 = arith.constant 0 : i32
    return %arg0, %c0_i32 : i32, i32
  }
}

</mosaic_0001>

<bundles_post_ra>
// kernel: tpu_custom_call.1
= control target key start
LH: loop header
LB: loop body
LE: loop exit
PB: predicated region body
PF: predicated region fallthrough
CT: control target
= control target key end

     0   :  { %10 = vsyncpa [#allocation3], 0  ;;  %s702_s0 = inlined_call_operand.vmem [shape: f32[8,3], index: 0, kind: input, shape index: {}]   ;;  %s703_s1 = inlined_call_operand.vmem [shape: f32[3,64], index: 1, kind: input, shape index: {}]   ;;  %s704_s2 = inlined_call_operand.vmem [shape: f32[1,64], index: 2, kind: input, shape index: {}]   ;;  %s705_s3 = inlined_call_operand.hbm [shape: bf16[64,784], index: 3, kind: input, shape index: {}]   ;;  %s706_s4 = inlined_call_operand.vmem [shape: f32[1,784], index: 4, kind: input, shape index: {}]   ;;  %s707_s5 = inlined_call_operand.hbm [shape: f32[8,784], index: 5, kind: output, shape index: {}]  }
   0x1   :  { %11 = vsyncpa [#allocation4], 0  ;;  %s628_s18 = smov [#allocation2]  }
   0x2   :  { %s23_s19 = sshll.u32 %s628_s18, 4  ;;  %s24_s19 = int_to_ptr.vmem [resolvable:$true] %s23_s19 }
   0x3   :  { %s592_s20 = scalar_lea.vmem %s24_s19, 3584  ;;  %p597_p1 = scmp.lt.s32.totalorder %s24_s19, %s24_s19 }
   0x4   :  { %p593_p0 = scmp.ne.s32.totalorder %s24_s19, %s592_s20  ;;  %p598_p2 = scmp.lt.s32.totalorder %s592_s20, %s592_s20 }
   0x6   :  { %p599_p3 = por %p598_p2, %p597_p1 }
   0x8   :  { %p600_p4 = pnand %p599_p3, %p593_p0 }
   0xa   :  { %603 = shalt.err (!%p600_p4)
}
   0xb   :  { %s629_s21 = smov 448   ;;  %s630_s22 = smov 28  }
   0xc   :  { %29 = dma.hbm_to_vmem [thread:$0]  %s705_s3, 3584, %s24_s19, [#allocation3], %s629_s21, %s629_s21, %s630_s22  }
   0xd   :  { %624 = dma.done.wait [#allocation3], 3584  }
   0xe   :  { %625 = vsyncadd [#allocation3], 4294963712  ;;  %v631_v0 = vmov 0   ;;  %v632_v1 = vmov 2   ;;  %v36_v2 = vld [vmem:[%s702_s0] sm:$0xff]  ;;  %v633_v8 = vmov 1   ;;  %v43_v22 = vlaneseq }
   0xf   :  { %540 = vset.pattern.permute.xlu0 %v631_v0  ;;  %542 = vset.pattern.permute.xlu1 %v632_v1  ;;  %v544_v3 = vld [vmem:[#allocation2 + $0xac] ss:$28 sps:$4 sm:$0xff]   ;;  %v546_v4 = vld [vmem:[#allocation2 + $0xb4] ss:$28 sps:$4 sm:$0xff]   ;;  %v552_v9 = vld [vmem:[#allocation2 + $0x7c] ss:$28 sps:$4 sm:$0xff]  }
  0x10   :  { %327 = vmatprep.mubr.bf16.mxu0 %v631_v0  ;;  %368 = vmatprep.mubr.bf16.mxu1 %v631_v0  ;;  %v548_v5 = vld [vmem:[#allocation2 + $0xa8] ss:$28 sps:$4 sm:$0xff]   ;;  %v549_v6 = vld [vmem:[#allocation2 + $0xb0] ss:$28 sps:$4 sm:$0xff]   ;;  %v555_v11 = vld [vmem:[#allocation2 + $0x78] ss:$28 sps:$4 sm:$0xff]  }
  0x11   :  { %40 = vperm.xlu0 %540, %v36_v2   ;;  %59 = vperm.xlu1 %542, %v36_v2   ;;  %v550_v7 = vld [vmem:[#allocation2 + $0x74] ss:$28 sps:$4 sm:$0xff]   ;;  %v556_v12 = vld [vmem:[#allocation2 + $0x3c] ss:$28 sps:$4 sm:$0xff]   ;;  %v558_v13 = vld [vmem:[#allocation2 + $0x44] ss:$28 sps:$4 sm:$0xff]  }
  0x12   :  { %303 = vmatprep.subr.bf16.mxu0 %v544_v3  ;;  %344 = vmatprep.subr.bf16.mxu1 %v546_v4  ;;  %v554_v10 = vld [vmem:[#allocation2 + $0x70] ss:$28 sps:$4 sm:$0xff]   ;;  %v560_v14 = vld [vmem:[#allocation2 + $0x38] ss:$28 sps:$4 sm:$0xff]   ;;  %v561_v15 = vld [vmem:[#allocation2 + $0x40] ss:$28 sps:$4 sm:$0xff]  }
  0x13   :  { %304 = vmatpush1.bf16.msra.mxu0 %v548_v5  ;;  %345 = vmatpush1.bf16.msra.mxu1 %v549_v6  ;;  %v562_v16 = vld [vmem:[#allocation2 + $0x4] ss:$28 sps:$4 sm:$0xff]   ;;  %v564_v17 = vld [vmem:[#allocation2 + $0xc] ss:$28 sps:$4 sm:$0xff]   ;;  %v570_v20 = vld [vmem:[#allocation2 + $0xbc] ss:$28 sps:$4 sm:$0xff]  }
  0x14   :  { %305 = vmatprep.subr.bf16.mxu0 %v550_v7  ;;  %346 = vmatprep.subr.bf16.mxu1 %v552_v9  ;;  %v566_v18 = vld [vmem:[#allocation2] ss:$28 sps:$4 sm:$0xff]   ;;  %v567_v19 = vld [vmem:[#allocation2 + $0x8] ss:$28 sps:$4 sm:$0xff]   ;;  %v634_v21 = vmov 0.0   ;;  %v676_v23 = vshrl.u32 %v43_v22, 7 }
  0x15   :  { %541 = vset.pattern.permute.xlu0 %v633_v8  ;;  %v37_v27 = vld [vmem:[%s703_s1] sm:$0x7]  ;;  %v568_v42 = vld [vmem:[#allocation2 + $0xb8] ss:$28 sps:$4 sm:$0xff]   ;;  %vm291_vm0 = vcmask 523264   ;;  %vm635_vm1 = vmmov 0  }
  0x16   :  { %49 = vperm.xlu0 %541, %v36_v2   ;;  %v45_v24 = vsub.s32 0, %v676_v23  ;;  %v54_v25 = vsub.s32 1, %v676_v23  ;;  %v64_v26 = vsub.s32 2, %v676_v23  ;;  %v481_v38 = vld [vmem:[%s704_s2] ss:$0 sm:$0xff]  ;;  %v126_v55 = vsub.s32 3, %v676_v23 }
  0x17   :  { %306 = vmatpush1.bf16.msra.mxu0 %v554_v10  ;;  %347 = vmatpush1.bf16.msra.mxu1 %v555_v11  ;;  %v571_v43 = vld [vmem:[#allocation2 + $0xc0] ss:$28 sps:$4 sm:$0xff]   ;;  %v575_v47 = vld [vmem:[#allocation2 + $0x88] ss:$28 sps:$4 sm:$0xff]   ;;  %v579_v50 = vld [vmem:[#allocation2 + $0x50] ss:$28 sps:$4 sm:$0xff]  }
  0x18   :  { %307 = vmatprep.subr.bf16.mxu0 %v556_v12  ;;  %348 = vmatprep.subr.bf16.mxu1 %v558_v13  ;;  %v46_v29 = vrot.slane %v37_v27, %v45_v24  ;;  %v55_v30 = vrot.slane %v37_v27, %v54_v25  ;;  %v65_v31 = vrot.slane %v37_v27, %v64_v26  ;;  %v574_v45 = vld [vmem:[#allocation2 + $0x84] ss:$28 sps:$4 sm:$0xff]   ;;  %v578_v48 = vld [vmem:[#allocation2 + $0x4c] ss:$28 sps:$4 sm:$0xff]   ;;  %v582_v51 = vld [vmem:[#allocation2 + $0x14] ss:$28 sps:$4 sm:$0xff]  }
  0x19   :  { %v572_v46 = vld [vmem:[#allocation2 + $0x80] ss:$28 sps:$4 sm:$0xff]   ;;  %v576_v49 = vld [vmem:[#allocation2 + $0x48] ss:$28 sps:$4 sm:$0xff]   ;;  %v580_v52 = vld [vmem:[#allocation2 + $0x10] ss:$28 sps:$4 sm:$0xff]  }
  0x1a   :  { %543 = vset.pattern.permute.xlu0 %v632_v1  ;;  %v583_v53 = vld [vmem:[#allocation2 + $0x18] ss:$28 sps:$4 sm:$0xff]   ;;  %v110_v54 = vld [vmem:[%s706_s4] sm:$0x7f]  ;;  %v130_v8 = vsub.s32 4, %v676_v23  ;;  %v138_v9 = vsub.s32 6, %v676_v23 }
  0x1b   :  { %308 = vmatpush1.bf16.msra.mxu0 %v560_v14  ;;  %349 = vmatpush1.bf16.msra.mxu1 %v561_v15  ;;  %v115_v56 = vrot.slane %v110_v54, %v45_v24  ;;  %v123_v57 = vrot.slane %v110_v54, %v64_v26  ;;  %v119_v58 = vrot.slane %v110_v54, %v54_v25  ;;  %v134_v10 = vsub.s32 5, %v676_v23  ;;  %s636_s4 = smov [#allocation5]  }
  0x1c   :  { %309 = vmatprep.subr.bf16.mxu0 %v562_v16  ;;  %350 = vmatprep.subr.bf16.mxu1 %v564_v17  ;;  %v127_v59 = vrot.slane %v110_v54, %v126_v55  ;;  %v131_v11 = vrot.slane %v110_v54, %v130_v8  ;;  %v139_v12 = vrot.slane %v110_v54, %v138_v9  ;;  %vm464_vm2 = vcmask 130048   ;;  %s472_s29 = sshll.u32 %s636_s4, 4  ;;  %s473_s29 = int_to_ptr.vmem [resolvable:$true] %s472_s29 }
  0x1d   :  { %v135_v13 = vrot.slane %v110_v54, %v134_v10  ;;  %s604_s30 = scalar_lea.vmem %s473_s29, 896  ;;  %p609_p6 = scmp.lt.s32.totalorder %s473_s29, %s473_s29 }
  0x1e   :  { %p605_p5 = scmp.ne.s32.totalorder %s473_s29, %s604_s30  ;;  %p610_p7 = scmp.lt.s32.totalorder %s604_s30, %s604_s30 }
  0x1f   :  { %310 = vmatpush1.bf16.msra.mxu0 %v566_v18  ;;  %351 = vmatpush1.bf16.msra.mxu1 %v567_v19 }
  0x20   :  { %385 = vmatprep.subr.bf16.mxu0 %v570_v20  ;;  %519 = vmatprep.subr.bf16.mxu1 %v634_v21  ;;  %p611_p8 = por %p610_p7, %p609_p6 }
  0x22   :  { %p612_p9 = pnand %p611_p8, %p605_p5 }
  0x8c   :  { %v41_v28 = vpop.permute.xlu0 %40  ;;  %v60_v32 = vpop.permute.xlu1 %59 }
  0x8d   :  { %v47_v34 = vmul.f32 %v46_v29, %v41_v28  ;;  %v66_v36 = vmul.f32 %v65_v31, %v60_v32 }
  0x91   :  { %v50_v33 = vpop.permute.xlu0 %49 }
  0x92   :  { %v56_v35 = vmul.f32 %v55_v30, %v50_v33 }
  0x94   :  { %v57_v37 = vadd.f32 %v56_v35, %v47_v34 }
  0x96   :  { %v67_v39 = vadd.f32 %v66_v36, %v57_v37 }
  0x98   :  { %v75_v40 = vadd.f32 %v481_v38, %v67_v39 }
  0x9a   :  { %v76_v41 = vmax.f32 %v75_v40, 0.0 }
  0x9c   :  { %v77_v44 = vpack.c.bf16 %v76_v41, %v76_v41 }
  0x9e   :  { %510 = vmatmul.mubr.msk.bf16.vlgmr.msra.gmra.mxu0 %vm291_vm0, %v77_v44  ;;  %511 = vmatmul.mubr.msk.bf16.vlgmr.msra.gmra.mxu1 %vm291_vm0, %v77_v44 }
  0x9f   :  { %386 = vmatpush1.bf16.msra.mxu0 %v568_v42  ;;  %520 = vmatpush3.bf16.msra.mxu1 %v571_v43 }
  0xa0   :  { %387 = vmatprep.subr.bf16.mxu0 %v574_v45  ;;  %521 = vmatprep.subr.bf16.mxu1 %v634_v21 }
  0xa1   :  { %409 = vmatprep.mubr.bf16.mxu0 %v631_v0  ;;  %527 = vmatprep.mubr.msk.bf16.mxu1 %vm635_vm1, %v634_v21 }
  0xa3   :  { %388 = vmatpush1.bf16.msra.mxu0 %v572_v46  ;;  %522 = vmatpush3.bf16.msra.mxu1 %v575_v47 }
  0xa4   :  { %389 = vmatprep.subr.bf16.mxu0 %v578_v48  ;;  %523 = vmatprep.subr.bf16.mxu1 %v634_v21 }
  0xa7   :  { %390 = vmatpush1.bf16.msra.mxu0 %v576_v49  ;;  %524 = vmatpush3.bf16.msra.mxu1 %v579_v50 }
  0xa8   :  { %391 = vmatprep.subr.bf16.mxu0 %v582_v51  ;;  %525 = vmatprep.subr.bf16.mxu1 %v634_v21 }
  0xab   :  { %392 = vmatpush1.bf16.msra.mxu0 %v580_v52  ;;  %526 = vmatpush3.bf16.msra.mxu1 %v583_v53 }
  0xae   :  { %512 = vmatmul.mubr.msk.bf16.vlgmr.msra.gmra.mxu0 %vm291_vm0, %v77_v44  ;;  %528 = vmatmul.mubr.msk.bf16.vlgmr.msra.gmra.mxu1 %vm291_vm0, %v77_v44 }
 0x15e   :  { %v329_v60 = vpop.f32.mrf.mxu0  ;;  %v370_v61 = vpop.f32.mrf.mxu1 }
 0x15f   :  { %v330_v62 = vadd.f32 %v329_v60, %v115_v56  ;;  %v371_v63 = vadd.f32 %v370_v61, %v123_v57 }
 0x160   :  { %v331_v0 = vpop.f32.mrf.mxu0  ;;  %v372_v1 = vpop.f32.mrf.mxu1 }
 0x161   :  { %458 = vst [vmem:[#allocation5] sm:$0xff] %v330_v62  ;;  %460 = vst [vmem:[#allocation5 + $0x10] sm:$0xff] %v371_v63  ;;  %v332_v2 = vadd.f32 %v331_v0, %v119_v58  ;;  %v373_v3 = vadd.f32 %v372_v1, %v127_v59 }
 0x162   :  { %v333_v4 = vpop.f32.mrf.mxu0  ;;  %v374_v5 = vpop.f32.mrf.mxu1 }
 0x163   :  { %459 = vst [vmem:[#allocation5 + $0x8] sm:$0xff] %v332_v2  ;;  %461 = vst [vmem:[#allocation5 + $0x18] sm:$0xff] %v373_v3 }
 0x164   :  { %v334_v6 = vpop.f32.mrf.mxu0  ;;  %v375_v7 = vpop.f32.mrf.mxu1 }
 0x16e   :  { %v411_v14 = vpop.f32.mrf.mxu0  ;;  %v452_v15 = vpop.f32.mrf.mxu1 }
 0x16f   :  { %v412_v16 = vadd.f32 %v411_v14, %v131_v11  ;;  %v453_v17 = vadd.f32 %v452_v15, %v139_v12 }
 0x170   :  { %v413_v18 = vpop.f32.mrf.mxu0  ;;  %v529_v19 = vpop.f32.mrf.mxu1 }
 0x171   :  { %462 = vst [vmem:[#allocation5 + $0x20] sm:$0xff] %v412_v16  ;;  %465 = vst.msk [vmem:[#allocation5 + $0x30] sm:$0xff] %vm464_vm2, %v453_v17  ;;  %v414_v20 = vadd.f32 %v413_v18, %v135_v13 }
 0x172   :  { %v415_v21 = vpop.f32.mrf.mxu0  ;;  %v455_v22 = vpop.f32.mrf.mxu1 }
 0x173   :  { %463 = vst [vmem:[#allocation5 + $0x28] sm:$0xff] %v414_v20 }
 0x174   :  { %v416_v23 = vpop.f32.mrf.mxu0  ;;  %v530_v24 = vpop.f32.mrf.mxu1 }
 0x175   :  { %615 = shalt.err (!%p612_p9)
}
 0x176   :  { %475 = dma.vmem_to_hbm [thread:$0]  %s473_s29, 896, %s707_s5, [#allocation4]  }
 0x177   :  { %626 = dma.done.wait [#allocation4], 896  }
 0x178   :  { %627 = vsyncadd [#allocation4], 4294966400 }
 0x179   :  { %479 = vsyncpa [#allocation3], 1 }
 0x17a   :  { %480 = vsyncpa [#allocation4], 1 }

</bundles_post_ra>
